<compile_context>
chip_gen: v7x
topology: tpu7x:2x2x1
jax: 0.10.0
libtpu: 0.0.40
codegen_flags: <defaults>
</compile_context>

<pallas_src>
import functools

import jax
import jax.numpy as jnp
from jax.experimental import pallas as pl
from jax.experimental.pallas import tpu as pltpu


def _softplus(x):
    # numerically stable softplus, matches torch.nn.functional.softplus
    return jnp.maximum(x, 0.0) + jnp.log1p(jnp.exp(-jnp.abs(x)))


def _round_up(x, m):
    return (x + m - 1) // m * m


# ---------------------------------------------------------------------------
# Kernel: one grid step = one batch tile through ALL packed MLPs.
# ---------------------------------------------------------------------------
def ff_packed_kernel(*refs, n_mid, out_size):
    """refs (n_mid > 0):
      xff_ref (Bt, Dff), initd_ref (1, out), w1_ref (Dff, NH), b1_ref (1, NH),
      wh_ref (n_mid, NH, NH), bh_ref (n_mid, 1, NH),
      wout_ref (NH, NO), bout_ref (1, NO),
      o_ref (Bt, n_dims*out)   <- flat, lane-dense output slab
    """
    if n_mid > 0:
        (xff_ref, initd_ref, w1_ref, b1_ref, wh_ref, bh_ref,
         wout_ref, bout_ref, o_ref) = refs
    else:
        (xff_ref, initd_ref, w1_ref, b1_ref,
         wout_ref, bout_ref, o_ref) = refs
        wh_ref = bh_ref = None

    cdt = w1_ref.dtype   # matmul operand dtype (bf16 or f32); accumulation is f32
    odt = o_ref.dtype

    h = jnp.dot(xff_ref[...], w1_ref[...],
                preferred_element_type=jnp.float32) + b1_ref[...]
    for j in range(n_mid):          # static unroll over hidden->hidden layers
        h = jnp.dot(_softplus(h).astype(cdt), wh_ref[j],
                    preferred_element_type=jnp.float32) + bh_ref[j]
    out = jnp.dot(_softplus(h).astype(cdt), wout_ref[...],
                  preferred_element_type=jnp.float32) + bout_ref[...]

    bt = o_ref.shape[0]
    # Lane-dense epilogue: two wide stores into the flat output slab.
    o_ref[:, :out_size] = jnp.broadcast_to(initd_ref[...],
                                           (bt, out_size)).astype(odt)
    o_ref[:, out_size:] = out.astype(odt)


def build_fourier_features(x, n_mlps, fourier_k):
    """PyTorch ordering: per input dim j -> [cos(x_j*2^0..2^{k-1}), sin(...), x_j]."""
    B = x.shape[0]
    xin = x[:, :n_mlps]
    if fourier_k == 0:
        return xin
    base = 2.0 ** jnp.arange(fourier_k, dtype=x.dtype)
    xc = xin[..., None] * base                                   # (B, n_mlps, k)
    xff = jnp.concatenate([jnp.cos(xc), jnp.sin(xc), xin[..., None]], axis=-1)
    return xff.reshape(B, n_mlps * (2 * fourier_k + 1))


def pack_params(params, *, n_dims, n_layers, hidden_size, out_size, fourier_k,
                compute_dtype=jnp.float32):
    """Pack per-MLP params into lane-packed block matrices.

    Call ONCE per weight update (or once at init for inference) and reuse the
    result across forwards — the block-diagonal scatters below cost HBM traffic
    comparable to the kernel's whole weight read.  Matmul operands
    (W1/Wh/Wout) are cast to compute_dtype (bf16 recommended on v5e/v6e/v7x);
    biases and init_d stay f32.
    """
    init_d, W1, b1, Wh, bh, Wout, bout = params
    n_mlps = n_dims - 1
    feat = 2 * fourier_k + 1
    Dff = n_mlps * feat
    H = hidden_size
    NH = n_mlps * H
    NO = n_mlps * out_size
    n_mid = n_layers - 1

    # block-lower-triangular first layer: column block idx uses rows [0, (idx+1)*feat)
    W1p = jnp.transpose(W1, (1, 0, 2)).reshape(Dff, NH).astype(compute_dtype)
    b1p = b1[:, 0, :].reshape(1, NH).astype(jnp.float32)

    if n_mid > 0:
        Whp = jnp.zeros((n_mid, NH, NH), jnp.float32)
        for idx in range(n_mlps):
            Whp = Whp.at[:, idx * H:(idx + 1) * H,
                         idx * H:(idx + 1) * H].set(Wh[idx])
        Whp = Whp.astype(compute_dtype)
        bhp = jnp.transpose(bh[:, :, 0, :], (1, 0, 2)).reshape(n_mid, 1, NH)
        bhp = bhp.astype(jnp.float32)
    else:
        Whp, bhp = None, None

    Woutp = jnp.zeros((NH, NO), jnp.float32)
    for idx in range(n_mlps):
        Woutp = Woutp.at[idx * H:(idx + 1) * H,
                         idx * out_size:(idx + 1) * out_size].set(Wout[idx])
    Woutp = Woutp.astype(compute_dtype)
    boutp = bout[:, 0, :].reshape(1, NO).astype(jnp.float32)

    initd2 = init_d.reshape(1, out_size).astype(jnp.float32)
    return initd2, W1p, b1p, Whp, bhp, Woutp, boutp


def ff_forward_pallas(x, packed, *, fourier_k, out_dtype=jnp.float32,
                      batch_tile=1024, single_buffer_weights=False):
    """Forward pass from pre-packed params (see pack_params).

    batch_tile: 1024-2048 is a good default on v5e/v6e (128 MiB VMEM);
    prefer 256-512 plus single_buffer_weights=True on v7x (64 MiB VMEM, 2 TCs).
    """
    initd, W1, b1, Wh, bh, Wout, bout = packed
    out_size = initd.shape[-1]
    Dff, NH = W1.shape
    NO = Wout.shape[-1]
    n_mlps = NO // out_size
    n_dims = n_mlps + 1
    n_mid = 0 if Wh is None else Wh.shape[0]
    cdt = W1.dtype
    Wflat = n_dims * out_size

    B = x.shape[0]
    xff = build_fourier_features(x, n_mlps, fourier_k).astype(cdt)

    # ---- batch tiling: batch is the only ("parallel") grid axis ----
    B8 = _round_up(B, 8)
    batch_tile = _round_up(max(batch_tile, 8), 8)
    if B8 <= batch_tile:
        # >=2 grid steps for mid-size batches so both v7x TensorCores get work
        bt = _round_up(pl.cdiv(B8, 2), 8) if B8 >= 512 else B8
    else:
        bt = batch_tile
    B_pad = _round_up(B8, bt)
    if B_pad != B:
        xff = jnp.pad(xff, ((0, B_pad - B), (0, 0)))

    # ---- specs: weights/biases use constant index_maps (VMEM-resident) ----
    def wspec(shape, imap):
        if single_buffer_weights:
            return pl.BlockSpec(shape, imap, pipeline_mode=pl.Buffered(1))
        return pl.BlockSpec(shape, imap)

    inputs = [xff, initd, W1, b1]
    in_specs = [
        pl.BlockSpec((bt, Dff), lambda b: (b, 0)),
        wspec((1, out_size), lambda b: (0, 0)),
        wspec((Dff, NH), lambda b: (0, 0)),
        wspec((1, NH), lambda b: (0, 0)),
    ]
    if n_mid > 0:
        inputs += [Wh, bh]
        in_specs += [
            wspec((n_mid, NH, NH), lambda b: (0, 0, 0)),
            wspec((n_mid, 1, NH), lambda b: (0, 0, 0)),
        ]
    inputs += [Wout, bout]
    in_specs += [
        wspec((NH, NO), lambda b: (0, 0)),
        wspec((1, NO), lambda b: (0, 0)),
    ]
    out_specs = pl.BlockSpec((bt, Wflat), lambda b: (b, 0))

    # ---- explicit VMEM budget from actual residency, clamped to chip capacity ----
    wsz = jnp.dtype(cdt).itemsize
    osz = jnp.dtype(out_dtype).itemsize
    wbuf = 1 if single_buffer_weights else 2
    w_elems = W1.size + (0 if Wh is None else Wh.size) + Wout.size
    s_elems = b1.size + (0 if bh is None else bh.size) + bout.size + initd.size
    est = (w_elems * wsz + s_elems * 4) * wbuf          # resident weights/biases
    est += 2 * bt * (Dff * wsz + Wflat * osz)           # double-buffered I/O tiles
    est += 4 * bt * max(NH, NO) * 4                     # h / softplus / cast temps
    cap = 64 << 20                                      # conservative (v7x physical)
    try:
        cap = int(getattr(pltpu.get_tpu_info(), "vmem_capacity_bytes", cap))
    except Exception:
        pass
    vmem_limit = int(min(max(est * 5 // 4 + (2 << 20), 16 << 20), (cap * 7) // 8))

    kernel = functools.partial(ff_packed_kernel, n_mid=n_mid, out_size=out_size)
    ds_flat = pl.pallas_call(
        kernel,
        out_shape=jax.ShapeDtypeStruct((B_pad, Wflat), out_dtype),
        grid=(B_pad // bt,),
        in_specs=in_specs,
        out_specs=out_specs,
        compiler_params=pltpu.CompilerParams(
            dimension_semantics=("parallel",),
            vmem_limit_bytes=vmem_limit),
    )(*inputs)
    # flat row layout is exactly [d_0 | d_1 | ... | d_{n_dims-1}] -> free reshape
    return ds_flat[:B].reshape(B, n_dims, out_size)


def ff_forward_ref(x, params, *, n_dims, n_layers, hidden_size, out_size,
                   fourier_k):
    """Pure-JAX reference reproducing the PyTorch forward exactly."""
    init_d, W1, b1, Wh, bh, Wout, bout = params
    B = x.shape[0]
    feat = 2 * fourier_k + 1
    ds = [jnp.broadcast_to(init_d, (B, out_size))]
    for idx in range(n_dims - 1):
        i = idx + 1
        inp = x[:, :i]
        if fourier_k != 0:
            base = 2.0 ** jnp.arange(fourier_k, dtype=x.dtype)
            inp_c = inp[..., None] * base
            inp_ff = jnp.concatenate(
                [jnp.cos(inp_c), jnp.sin(inp_c), inp[..., None]],
                axis=-1).reshape(B, i * feat)
        else:
            inp_ff = inp
        h = inp_ff @ W1[idx, : i * feat, :] + b1[idx, 0]
        for j in range(n_layers - 1):
            h = _softplus(h) @ Wh[idx, j] + bh[idx, j, 0]
        out = _softplus(h) @ Wout[idx] + bout[idx, 0]
        ds.append(out)
    return jnp.stack(ds, axis=-2)


def init_params(key, *, n_dims, n_layers, hidden_size, out_size, fourier_k):
    n_mlps = n_dims - 1
    feat = 2 * fourier_k + 1
    Dff = n_mlps * feat
    n_mid = n_layers - 1
    ks = jax.random.split(key, 7)
    init_d = jax.random.normal(ks[0], (out_size,), jnp.float32)
    # first-layer weights: real shape (i*feat, H) per MLP i, zero-padded to Dff rows
    w1_full = 0.1 * jax.random.normal(ks[1], (n_mlps, Dff, hidden_size), jnp.float32)
    W1 = jnp.zeros((n_mlps, Dff, hidden_size), jnp.float32)
    for idx in range(n_mlps):
        din = (idx + 1) * feat
        W1 = W1.at[idx, :din, :].set(w1_full[idx, :din, :])
    b1 = 0.1 * jax.random.normal(ks[2], (n_mlps, 1, hidden_size), jnp.float32)
    Wh = 0.1 * jax.random.normal(ks[3], (n_mlps, max(n_mid, 1), hidden_size,
                                         hidden_size), jnp.float32)[:, :n_mid]
    bh = 0.1 * jax.random.normal(ks[4], (n_mlps, max(n_mid, 1), 1,
                                         hidden_size), jnp.float32)[:, :n_mid]
    Wout = 0.1 * jax.random.normal(ks[5], (n_mlps, hidden_size, out_size), jnp.float32)
    bout = 0.1 * jax.random.normal(ks[6], (n_mlps, 1, out_size), jnp.float32)
    return init_d, W1, b1, Wh, bh, Wout, bout


if __name__ == "__main__":
    # small, deterministic config (stands in for wandb.config / dataset n_dims)
    B = 8
    n_dims = 6
    n_layers = 3
    hidden_size = 32
    out_size = 64
    fourier_k = 2

    key = jax.random.PRNGKey(0)
    kx, kp, kx2 = jax.random.split(key, 3)
    x = jax.random.uniform(kx, (B, n_dims), jnp.float32)

    params = init_params(kp, n_dims=n_dims, n_layers=n_layers,
                         hidden_size=hidden_size, out_size=out_size,
                         fourier_k=fourier_k)
    cfg = dict(n_dims=n_dims, n_layers=n_layers, hidden_size=hidden_size,
               out_size=out_size, fourier_k=fourier_k)

    ds_ref = ff_forward_ref(x, params, **cfg)

    # --- f32 operands, f32 output: strict check (packing hoisted, done once) ---
    packed_f32 = pack_params(params, compute_dtype=jnp.float32, **cfg)
    ds = ff_forward_pallas(x, packed_f32, fourier_k=fourier_k)
    ds = jax.block_until_ready(ds)
    assert ds.shape == (B, n_dims, out_size), ds.shape
    assert jnp.allclose(ds, ds_ref, rtol=1e-5, atol=1e-5), \
        float(jnp.max(jnp.abs(ds - ds_ref)))

    # --- bf16 operands + bf16 output (recommended on v5e/v6e/v7x): loose check ---
    packed_bf16 = pack_params(params, compute_dtype=jnp.bfloat16, **cfg)
    ds_bf16 = ff_forward_pallas(x, packed_bf16, fourier_k=fourier_k,
                                out_dtype=jnp.bfloat16)
    ds_bf16 = jax.block_until_ready(ds_bf16)
    assert ds_bf16.dtype == jnp.bfloat16
    assert jnp.allclose(ds_bf16.astype(jnp.float32), ds_ref,
                        rtol=5e-2, atol=5e-2), \
        float(jnp.max(jnp.abs(ds_bf16.astype(jnp.float32) - ds_ref)))

    # --- larger batch: exercises >=2 grid steps (v7x megacore) + row padding ---
    B2 = 600
    x2 = jax.random.uniform(kx2, (B2, n_dims), jnp.float32)
    ds2 = ff_forward_pallas(x2, packed_f32, fourier_k=fourier_k)
    ds2 = jax.block_until_ready(ds2)
    ds2_ref = ff_forward_ref(x2, params, **cfg)
    assert ds2.shape == (B2, n_dims, out_size)
    assert jnp.allclose(ds2, ds2_ref, rtol=1e-5, atol=1e-5), \
        float(jnp.max(jnp.abs(ds2 - ds2_ref)))

    # TODO(synk): compute_loss / compute_smoothed_loss depend on Adacat /
    # TruncatedNormal log_prob, which live outside the forward pass and are
    # not translated here.
    print("KERNEL_OK")
</pallas_src>

<mosaic_0001>
module attributes {stable_mosaic.version = 11 : i64} {
  func.func @ff_packed_kernel(%arg0: i32, %arg1: memref<8x25xf32, #tpu.memory_space<vmem>>, %arg2: memref<1x64xf32, #tpu.memory_space<vmem>>, %arg3: memref<25x160xf32, #tpu.memory_space<vmem>>, %arg4: memref<1x160xf32, #tpu.memory_space<vmem>>, %arg5: memref<2x160x160xf32, #tpu.memory_space<vmem>>, %arg6: memref<2x1x160xf32, #tpu.memory_space<vmem>>, %arg7: memref<160x320xf32, #tpu.memory_space<vmem>>, %arg8: memref<1x320xf32, #tpu.memory_space<vmem>>, %arg9: memref<8x384xf32, #tpu.memory_space<vmem>>) attributes {dimension_semantics = [#tpu.dimension_semantics<parallel>], iteration_bounds = array<i64: 1>, scalar_prefetch = 0 : i64, scratch_operands = 0 : i64, tpu.core_type = #tpu.core_type<tc>, window_params = [{transform_indices = @transform_0, window_bounds = array<i64: 8, 25>}, {pipeline_mode = #tpu.pipeline_mode<synchronous>, transform_indices = @transform_1, window_bounds = array<i64: 1, 64>}, {pipeline_mode = #tpu.pipeline_mode<synchronous>, transform_indices = @transform_2, window_bounds = array<i64: 25, 160>}, {pipeline_mode = #tpu.pipeline_mode<synchronous>, transform_indices = @transform_3, window_bounds = array<i64: 1, 160>}, {pipeline_mode = #tpu.pipeline_mode<synchronous>, transform_indices = @transform_4, window_bounds = array<i64: 2, 160, 160>}, {pipeline_mode = #tpu.pipeline_mode<synchronous>, transform_indices = @transform_5, window_bounds = array<i64: 2, 1, 160>}, {pipeline_mode = #tpu.pipeline_mode<synchronous>, transform_indices = @transform_6, window_bounds = array<i64: 160, 320>}, {pipeline_mode = #tpu.pipeline_mode<synchronous>, transform_indices = @transform_7, window_bounds = array<i64: 1, 320>}, {transform_indices = @transform_8, window_bounds = array<i64: 8, 384>}]} {
    %c0 = arith.constant 0 : index
    %c0_0 = arith.constant 0 : index
    %0 = vector.load %arg1[%c0, %c0_0] : memref<8x25xf32, #tpu.memory_space<vmem>>, vector<8x25xf32>
    %c0_1 = arith.constant 0 : index
    %c0_2 = arith.constant 0 : index
    %1 = vector.load %arg3[%c0_1, %c0_2] : memref<25x160xf32, #tpu.memory_space<vmem>>, vector<25x160xf32>
    %cst = arith.constant dense<0.000000e+00> : vector<8x160xf32>
    %2 = tpu.matmul %0, %1, %cst {dimension_numbers = #tpu.dot_dimension_numbers<[1], [0], [0], [1], [0, 0, 1, 1], [], []>} : vector<8x25xf32>, vector<25x160xf32>, vector<8x160xf32> -> vector<8x160xf32>
    %c0_3 = arith.constant 0 : index
    %c0_4 = arith.constant 0 : index
    %3 = vector.load %arg4[%c0_3, %c0_4] : memref<1x160xf32, #tpu.memory_space<vmem>>, vector<1x160xf32>
    %4 = vector.broadcast %3 : vector<1x160xf32> to vector<8x160xf32>
    %5 = arith.addf %2, %4 : vector<8x160xf32>
    %cst_5 = arith.constant 0.000000e+00 : f32
    %6 = vector.broadcast %cst_5 : f32 to vector<8x160xf32>
    %7 = arith.maximumf %5, %6 : vector<8x160xf32>
    %8 = math.absf %5 : vector<8x160xf32>
    %cst_6 = arith.constant 0.000000e+00 : f32
    %9 = vector.broadcast %cst_6 : f32 to vector<8x160xf32>
    %10 = arith.subf %9, %8 : vector<8x160xf32>
    %11 = math.exp %10 : vector<8x160xf32>
    %12 = math.log1p %11 : vector<8x160xf32>
    %13 = arith.addf %7, %12 : vector<8x160xf32>
    %c0_7 = arith.constant 0 : index
    %c0_8 = arith.constant 0 : index
    %c0_9 = arith.constant 0 : index
    %14 = vector.load %arg5[%c0_7, %c0_8, %c0_9] : memref<2x160x160xf32, #tpu.memory_space<vmem>>, vector<1x160x160xf32>
    %15 = vector.shape_cast %14 : vector<1x160x160xf32> to vector<160x160xf32>
    %cst_10 = arith.constant dense<0.000000e+00> : vector<8x160xf32>
    %16 = tpu.matmul %13, %15, %cst_10 {dimension_numbers = #tpu.dot_dimension_numbers<[1], [0], [0], [1], [0, 0, 1, 1], [], []>} : vector<8x160xf32>, vector<160x160xf32>, vector<8x160xf32> -> vector<8x160xf32>
    %c0_11 = arith.constant 0 : index
    %c0_12 = arith.constant 0 : index
    %c0_13 = arith.constant 0 : index
    %17 = vector.load %arg6[%c0_11, %c0_12, %c0_13] : memref<2x1x160xf32, #tpu.memory_space<vmem>>, vector<1x1x160xf32>
    %18 = vector.shape_cast %17 : vector<1x1x160xf32> to vector<1x160xf32>
    %19 = vector.broadcast %18 : vector<1x160xf32> to vector<8x160xf32>
    %20 = arith.addf %16, %19 : vector<8x160xf32>
    %cst_14 = arith.constant 0.000000e+00 : f32
    %21 = vector.broadcast %cst_14 : f32 to vector<8x160xf32>
    %22 = arith.maximumf %20, %21 : vector<8x160xf32>
    %23 = math.absf %20 : vector<8x160xf32>
    %cst_15 = arith.constant 0.000000e+00 : f32
    %24 = vector.broadcast %cst_15 : f32 to vector<8x160xf32>
    %25 = arith.subf %24, %23 : vector<8x160xf32>
    %26 = math.exp %25 : vector<8x160xf32>
    %27 = math.log1p %26 : vector<8x160xf32>
    %28 = arith.addf %22, %27 : vector<8x160xf32>
    %c1 = arith.constant 1 : index
    %c0_16 = arith.constant 0 : index
    %c0_17 = arith.constant 0 : index
    %29 = vector.load %arg5[%c1, %c0_16, %c0_17] : memref<2x160x160xf32, #tpu.memory_space<vmem>>, vector<1x160x160xf32>
    %30 = vector.shape_cast %29 : vector<1x160x160xf32> to vector<160x160xf32>
    %cst_18 = arith.constant dense<0.000000e+00> : vector<8x160xf32>
    %31 = tpu.matmul %28, %30, %cst_18 {dimension_numbers = #tpu.dot_dimension_numbers<[1], [0], [0], [1], [0, 0, 1, 1], [], []>} : vector<8x160xf32>, vector<160x160xf32>, vector<8x160xf32> -> vector<8x160xf32>
    %c1_19 = arith.constant 1 : index
    %c0_20 = arith.constant 0 : index
    %c0_21 = arith.constant 0 : index
    %32 = vector.load %arg6[%c1_19, %c0_20, %c0_21] : memref<2x1x160xf32, #tpu.memory_space<vmem>>, vector<1x1x160xf32>
    %33 = vector.shape_cast %32 : vector<1x1x160xf32> to vector<1x160xf32>
    %34 = vector.broadcast %33 : vector<1x160xf32> to vector<8x160xf32>
    %35 = arith.addf %31, %34 : vector<8x160xf32>
    %cst_22 = arith.constant 0.000000e+00 : f32
    %36 = vector.broadcast %cst_22 : f32 to vector<8x160xf32>
    %37 = arith.maximumf %35, %36 : vector<8x160xf32>
    %38 = math.absf %35 : vector<8x160xf32>
    %cst_23 = arith.constant 0.000000e+00 : f32
    %39 = vector.broadcast %cst_23 : f32 to vector<8x160xf32>
    %40 = arith.subf %39, %38 : vector<8x160xf32>
    %41 = math.exp %40 : vector<8x160xf32>
    %42 = math.log1p %41 : vector<8x160xf32>
    %43 = arith.addf %37, %42 : vector<8x160xf32>
    %c0_24 = arith.constant 0 : index
    %c0_25 = arith.constant 0 : index
    %44 = vector.load %arg7[%c0_24, %c0_25] : memref<160x320xf32, #tpu.memory_space<vmem>>, vector<160x320xf32>
    %cst_26 = arith.constant dense<0.000000e+00> : vector<8x320xf32>
    %45 = tpu.matmul %43, %44, %cst_26 {dimension_numbers = #tpu.dot_dimension_numbers<[1], [0], [0], [1], [0, 0, 1, 1], [], []>} : vector<8x160xf32>, vector<160x320xf32>, vector<8x320xf32> -> vector<8x320xf32>
    %c0_27 = arith.constant 0 : index
    %c0_28 = arith.constant 0 : index
    %46 = vector.load %arg8[%c0_27, %c0_28] : memref<1x320xf32, #tpu.memory_space<vmem>>, vector<1x320xf32>
    %47 = vector.broadcast %46 : vector<1x320xf32> to vector<8x320xf32>
    %48 = arith.addf %45, %47 : vector<8x320xf32>
    %c0_29 = arith.constant 0 : index
    %c0_30 = arith.constant 0 : index
    %49 = vector.load %arg2[%c0_29, %c0_30] : memref<1x64xf32, #tpu.memory_space<vmem>>, vector<1x64xf32>
    %50 = vector.shape_cast %49 : vector<1x64xf32> to vector<1x64xf32>
    %51 = vector.broadcast %50 : vector<1x64xf32> to vector<8x64xf32>
    %c0_31 = arith.constant 0 : index
    %c0_32 = arith.constant 0 : index
    %52 = vector.load %arg9[%c0_31, %c0_32] : memref<8x384xf32, #tpu.memory_space<vmem>>, vector<8x64xf32>
    tpu.vector_store %arg9[%c0_31, %c0_32], %51 {strides = array<i32>} : memref<8x384xf32, #tpu.memory_space<vmem>>, vector<8x64xf32>,
    %c0_33 = arith.constant 0 : index
    %c64 = arith.constant 64 : index
    %53 = vector.load %arg9[%c0_33, %c64] : memref<8x384xf32, #tpu.memory_space<vmem>>, vector<8x320xf32>
    tpu.vector_store %arg9[%c0_33, %c64], %48 {strides = array<i32>} : memref<8x384xf32, #tpu.memory_space<vmem>>, vector<8x320xf32>,
    return
  }
  func.func @transform_0(%arg0: i32) -> (i32, i32) {
    %c0_i32 = arith.constant 0 : i32
    %c0_i32_0 = arith.constant 0 : i32
    return %arg0, %c0_i32 : i32, i32
  }
  func.func @transform_1(%arg0: i32) -> (i32, i32) {
    %c0_i32 = arith.constant 0 : i32
    %c0_i32_0 = arith.constant 0 : i32
    %c0_i32_1 = arith.constant 0 : i32
    return %c0_i32, %c0_i32_0 : i32, i32
  }
  func.func @transform_2(%arg0: i32) -> (i32, i32) {
    %c0_i32 = arith.constant 0 : i32
    %c0_i32_0 = arith.constant 0 : i32
    %c0_i32_1 = arith.constant 0 : i32
    return %c0_i32, %c0_i32_0 : i32, i32
  }
  func.func @transform_3(%arg0: i32) -> (i32, i32) {
    %c0_i32 = arith.constant 0 : i32
    %c0_i32_0 = arith.constant 0 : i32
    %c0_i32_1 = arith.constant 0 : i32
    return %c0_i32, %c0_i32_0 : i32, i32
  }
  func.func @transform_4(%arg0: i32) -> (i32, i32, i32) {
    %c0_i32 = arith.constant 0 : i32
    %c0_i32_0 = arith.constant 0 : i32
    %c0_i32_1 = arith.constant 0 : i32
    %c0_i32_2 = arith.constant 0 : i32
    return %c0_i32, %c0_i32_0, %c0_i32_1 : i32, i32, i32
  }
  func.func @transform_5(%arg0: i32) -> (i32, i32, i32) {
    %c0_i32 = arith.constant 0 : i32
    %c0_i32_0 = arith.constant 0 : i32
    %c0_i32_1 = arith.constant 0 : i32
    %c0_i32_2 = arith.constant 0 : i32
    return %c0_i32, %c0_i32_0, %c0_i32_1 : i32, i32, i32
  }
  func.func @transform_6(%arg0: i32) -> (i32, i32) {
    %c0_i32 = arith.constant 0 : i32
    %c0_i32_0 = arith.constant 0 : i32
    %c0_i32_1 = arith.constant 0 : i32
    return %c0_i32, %c0_i32_0 : i32, i32
  }
  func.func @transform_7(%arg0: i32) -> (i32, i32) {
    %c0_i32 = arith.constant 0 : i32
    %c0_i32_0 = arith.constant 0 : i32
    %c0_i32_1 = arith.constant 0 : i32
    return %c0_i32, %c0_i32_0 : i32, i32
  }
  func.func @transform_8(%arg0: i32) -> (i32, i32) {
    %c0_i32 = arith.constant 0 : i32
    %c0_i32_0 = arith.constant 0 : i32
    return %arg0, %c0_i32 : i32, i32
  }
}

</mosaic_0001>

<bundles_post_ra>
// kernel: tpu_custom_call.1
= control target key start
LH: loop header
LB: loop body
LE: loop exit
PB: predicated region body
PF: predicated region fallthrough
CT: control target
= control target key end

     0   :  { %13 = vsyncpa [#allocation3], 0  ;;  %s1337_s0 = inlined_call_operand.hbm [shape: f32[8,25], index: 0, kind: input, shape index: {}]   ;;  %s1338_s1 = inlined_call_operand.hbm [shape: f32[1,64], index: 1, kind: input, shape index: {}]   ;;  %s1339_s2 = inlined_call_operand.hbm [shape: f32[25,160], index: 2, kind: input, shape index: {}]   ;;  %s1340_s3 = inlined_call_operand.vmem [shape: f32[1,160], index: 3, kind: input, shape index: {}]   ;;  %s1341_s4 = inlined_call_operand.hbm [shape: f32[2,160,160], index: 4, kind: input, shape index: {}]   ;;  %s1342_s5 = inlined_call_operand.vmem [shape: f32[2,1,160], index: 5, kind: input, shape index: {}]   ;;  %s1343_s6 = inlined_call_operand.hbm [shape: f32[160,320], index: 6, kind: input, shape index: {}]   ;;  %s1344_s7 = inlined_call_operand.vmem [shape: f32[1,320], index: 7, kind: input, shape index: {}]   ;;  %s1345_s8 = inlined_call_operand.hbm [shape: f32[8,384], index: 8, kind: output, shape index: {}]  }
   0x1   :  { %14 = vsyncpa [#allocation6], 0 }
   0x2   :  { %15 = vsyncpa [#allocation9], 0 }
   0x3   :  { %16 = vsyncpa [#allocation4], 0  ;;  %s1154_s27 = smov [#allocation5]   ;;  %s1014_s9 = scalar_lea.hbm %s1338_s1, 16 }
   0x4   :  { %s33_s28 = sshll.u32 %s1154_s27, 4  ;;  %p1015_p0 = scmp.ne.s32.totalorder %s1338_s1, %s1014_s9  ;;  %s34_s28 = int_to_ptr.vmem [resolvable:$true] %s33_s28 }
   0x5   :  { %p1018_p1 = scmp.lt.u32.totalorder %s1014_s9, %s1338_s1 }
   0x7   :  { %p1020_p2 = pnand %p1018_p1, %p1015_p0 }
   0x9   :  { %1023 = shalt.err (!%p1020_p2)
}
   0xa   :  { %s1024_s14 = scalar_lea.vmem %s34_s28, 16  ;;  %s1028_s15 = scalar_lea.vmem %s34_s28, 32 }
   0xb   :  { %p1025_p3 = scmp.ne.s32.totalorder %s34_s28, %s1024_s14  ;;  %p1029_p4 = scmp.lt.s32.totalorder %s34_s28, %s34_s28 }
   0xc   :  { %p1030_p5 = scmp.lt.s32.totalorder %s1028_s15, %s1024_s14 }
   0xe   :  { %p1031_p6 = por %p1030_p5, %p1029_p4 }
  0x10   :  { %p1032_p7 = pnand %p1031_p6, %p1025_p3 }
  0x12   :  { %1035 = shalt.err (!%p1032_p7)
}
  0x13   :  { %36 = dma.hbm_to_vmem [thread:$0]  %s1338_s1, 16, %s34_s28, [#allocation6]  }
  0x14   :  { %s1155_s18 = smov [#allocation8]   ;;  %s1156_s20 = smov [#allocation2]  }
  0x15   :  { %s56_s19 = sshll.u32 %s1155_s18, 4  ;;  %s23_s21 = sshll.u32 %s1156_s20, 4  ;;  %s57_s19 = int_to_ptr.vmem [resolvable:$true] %s56_s19  ;;  %s24_s21 = int_to_ptr.vmem [resolvable:$true] %s23_s21 }
  0x16   :  { %s1036_s24 = scalar_lea.hbm %s1341_s4, 10240 }
  0x17   :  { %p1037_p8 = scmp.ne.s32.totalorder %s1341_s4, %s1036_s24  ;;  %p1040_p9 = scmp.lt.u32.totalorder %s1036_s24, %s1341_s4 }
  0x19   :  { %p1042_p10 = pnand %p1040_p9, %p1037_p8 }
  0x1b   :  { %1045 = shalt.err (!%p1042_p10)
}
  0x1c   :  { %s1046_s1 = scalar_lea.vmem %s57_s19, 10240  ;;  %p1051_p12 = scmp.lt.s32.totalorder %s57_s19, %s57_s19 }
  0x1d   :  { %p1047_p11 = scmp.ne.s32.totalorder %s57_s19, %s1046_s1  ;;  %p1052_p13 = scmp.lt.s32.totalorder %s1046_s1, %s1046_s1 }
  0x1f   :  { %p1053_p0 = por %p1052_p13, %p1051_p12 }
  0x21   :  { %p1054_p1 = pnand %p1053_p0, %p1047_p11 }
  0x23   :  { %1057 = shalt.err (!%p1054_p1)
}
  0x24   :  { %s1157_s28 = smov 256   ;;  %s1158_s30 = smov 16  }
  0x25   :  { %62 = dma.hbm_to_vmem [thread:$0]  %s1341_s4, 10240, %s57_s19, [#allocation9], %s1157_s28, %s1157_s28, %s1158_s30  }
  0x26   :  { %s1058_s13 = scalar_lea.hbm %s1337_s0, 128 }
  0x27   :  { %p1059_p2 = scmp.ne.s32.totalorder %s1337_s0, %s1058_s13  ;;  %p1062_p3 = scmp.lt.u32.totalorder %s1058_s13, %s1337_s0 }
  0x29   :  { %p1064_p4 = pnand %p1062_p3, %p1059_p2 }
  0x2b   :  { %1067 = shalt.err (!%p1064_p4)
}
  0x2c   :  { %s1068_s18 = scalar_lea.vmem %s24_s21, 128  ;;  %p1073_p6 = scmp.lt.s32.totalorder %s24_s21, %s24_s21 }
  0x2d   :  { %p1069_p5 = scmp.ne.s32.totalorder %s24_s21, %s1068_s18  ;;  %p1074_p7 = scmp.lt.s32.totalorder %s1068_s18, %s1068_s18 }
  0x2f   :  { %p1075_p8 = por %p1074_p7, %p1073_p6 }
  0x31   :  { %p1076_p9 = pnand %p1075_p8, %p1069_p5 }
  0x33   :  { %1079 = shalt.err (!%p1076_p9)
}
  0x34   :  { %26 = dma.hbm_to_vmem [thread:$0]  %s1337_s0, 128, %s24_s21, [#allocation3]  }
  0x35   :  { %s1159_s20 = smov [#allocation7]   ;;  %s1160_s23 = smov [#allocation10]  }
  0x36   :  { %s42_s22 = sshll.u32 %s1159_s20, 4  ;;  %s70_s24 = sshll.u32 %s1160_s23, 4  ;;  %s43_s22 = int_to_ptr.vmem [resolvable:$true] %s42_s22  ;;  %s71_s24 = int_to_ptr.vmem [resolvable:$true] %s70_s24 }
  0x37   :  { %s1080_s27 = scalar_lea.hbm %s1339_s2, 1024 }
  0x38   :  { %p1081_p10 = scmp.ne.s32.totalorder %s1339_s2, %s1080_s27  ;;  %p1084_p11 = scmp.lt.u32.totalorder %s1080_s27, %s1339_s2 }
  0x3a   :  { %p1086_p12 = pnand %p1084_p11, %p1081_p10 }
  0x3c   :  { %1089 = shalt.err (!%p1086_p12)
}
  0x3d   :  { %s1090_s0 = scalar_lea.vmem %s43_s22, 1024  ;;  %p1095_p0 = scmp.lt.s32.totalorder %s43_s22, %s43_s22 }
  0x3e   :  { %p1091_p13 = scmp.ne.s32.totalorder %s43_s22, %s1090_s0  ;;  %p1096_p1 = scmp.lt.s32.totalorder %s1090_s0, %s1090_s0 }
  0x40   :  { %p1097_p2 = por %p1096_p1, %p1095_p0 }
  0x42   :  { %p1098_p3 = pnand %p1097_p2, %p1091_p13 }
  0x44   :  { %1101 = shalt.err (!%p1098_p3)
}
  0x45   :  { %48 = dma.hbm_to_vmem [thread:$0]  %s1339_s2, 1024, %s43_s22, [#allocation6], %s1157_s28, %s1157_s28, %s1158_s30  }
  0x46   :  { %s1102_s14 = scalar_lea.hbm %s1343_s6, 7680 }
  0x47   :  { %p1103_p4 = scmp.ne.s32.totalorder %s1343_s6, %s1102_s14  ;;  %p1106_p5 = scmp.lt.u32.totalorder %s1102_s14, %s1343_s6 }
  0x49   :  { %p1108_p6 = pnand %p1106_p5, %p1103_p4 }
  0x4b   :  { %1111 = shalt.err (!%p1108_p6)
}
  0x4c   :  { %s1112_s4 = scalar_lea.vmem %s71_s24, 7680  ;;  %p1117_p8 = scmp.lt.s32.totalorder %s71_s24, %s71_s24 }
  0x4d   :  { %p1113_p7 = scmp.ne.s32.totalorder %s71_s24, %s1112_s4  ;;  %p1118_p9 = scmp.lt.s32.totalorder %s1112_s4, %s1112_s4 }
  0x4f   :  { %p1119_p10 = por %p1118_p9, %p1117_p8 }
  0x51   :  { %p1120_p11 = pnand %p1119_p10, %p1113_p7 }
  0x53   :  { %1123 = shalt.err (!%p1120_p11)
}
  0x54   :  { %s1161_s2 = smov 384   ;;  %s1162_s28 = smov 24  }
  0x55   :  { %76 = dma.hbm_to_vmem [thread:$0]  %s1343_s6, 7680, %s71_s24, [#allocation9], %s1161_s2, %s1161_s2, %s1162_s28  }
  0x56   :  { %1146 = dma.done.wait [#allocation3], 128  }
  0x57   :  { %1147 = vsyncadd [#allocation3], 4294967168 }
  0x58   :  { %1148 = dma.done.wait [#allocation6], 1040  }
  0x59   :  { %1149 = vsyncadd [#allocation6], 4294966256 }
  0x5a   :  { %1150 = dma.done.wait [#allocation9], 17920  }
  0x5b   :  { %1151 = vsyncadd [#allocation9], 4294949376  ;;  %v1163_v0 = vmov 0.0   ;;  %vm119_vm0 = vcmask 1040384   ;;  %v96_v1 = vld [vmem:[#allocation7 + $0x8] sm:$0xff]  ;;  %v98_v2 = vld [vmem:[#allocation7 + $0x18] sm:$0xff] }
  0x5c   :  { %190 = vmatprep.mubr.f32.mxu0 %v1163_v0  ;;  %v95_v3 = vld [vmem:[#allocation7] sm:$0xff]  ;;  %v816_v4 = vpack.c.bf16 %v98_v2, %v96_v1  ;;  %v97_v5 = vld [vmem:[#allocation7 + $0x10] sm:$0xff]  ;;  %v100_v6 = vld [vmem:[#allocation7 + $0x28] sm:$0xff]  ;;  %vm1164_vm1 = vmmov 1   ;;  %vm115_vm3 = vcmask 203776   ;;  %vm279_vm6 = vcmask 261120  }
  0x5d   :  { %v102_v7 = vld [vmem:[#allocation7 + $0x38] sm:$0x1]  ;;  %v818_v8 = vpack.c.bf16 %v97_v5, %v95_v3  ;;  %vm821_vm2 = vmpackc.low %vm119_vm0, %vm1164_vm1  ;;  %v99_v10 = vld [vmem:[#allocation7 + $0x20] sm:$0xff]  ;;  %vm770_vm11 = vcmask 523264   ;;  %s1166_s26 = smov 64   ;;  %vm786_vm12 = vcmask 1048064  }
  0x5e   :  { %v820_v9 = vpack.c.bf16 %v102_v7, %v100_v6  ;;  %v101_v11 = vld [vmem:[#allocation7 + $0x30] sm:$0x1]  ;;  %817 = vmatprep.subr.bf16.mxu0 %v816_v4  ;;  %v94_v13 = vld [vmem:[#allocation2] sm:$0xff]  ;;  %v228_v14 = vld [vmem:[#allocation8 + $0x8] sm:$0xff] }
  0x5f   :  { %819 = vmatpush1.bf16.msra.mxu0 %v818_v8  ;;  %v823_v12 = vpack.c.bf16 %v101_v11, %v99_v10  ;;  %v230_v15 = vld [vmem:[#allocation8 + $0x18] sm:$0xff]  ;;  %v227_v17 = vld [vmem:[#allocation8] sm:$0xff]  ;;  %v229_v18 = vld [vmem:[#allocation8 + $0x10] sm:$0xff]  ;;  %v105_v10 = vlaneseq }
  0x60   :  { %822 = vmatprep.subr.msk.bf16.mxu0 %vm821_vm2, %v820_v9  ;;  %v826_v16 = vpack.c.bf16 %v230_v15, %v228_v14  ;;  %v828_v19 = vpack.c.bf16 %v229_v18, %v227_v17  ;;  %v232_v20 = vld [vmem:[#allocation8 + $0x28] sm:$0xff]  ;;  %v234_v21 = vld [vmem:[#allocation8 + $0x38] sm:$0xff]  ;;  %v231_v23 = vld [vmem:[#allocation8 + $0x20] sm:$0xff] }
  0x61   :  { %v830_v22 = vpack.c.bf16 %v234_v21, %v232_v20  ;;  %v233_v24 = vld [vmem:[#allocation8 + $0x30] sm:$0xff]  ;;  %v236_v26 = vld [vmem:[#allocation8 + $0x48] sm:$0xff]  ;;  %v238_v27 = vld [vmem:[#allocation8 + $0x58] sm:$0xff]  ;;  %v1279_v11 = vshrl.u32 %v105_v10, 7 }
  0x62   :  { %827 = vmatprep.subr.bf16.mxu1 %v826_v16  ;;  %v832_v25 = vpack.c.bf16 %v233_v24, %v231_v23  ;;  %v834_v28 = vpack.c.bf16 %v238_v27, %v236_v26  ;;  %v235_v29 = vld [vmem:[#allocation8 + $0x40] sm:$0xff]  ;;  %v237_v30 = vld [vmem:[#allocation8 + $0x50] sm:$0xff]  ;;  %v240_v32 = vld [vmem:[#allocation8 + $0x68] sm:$0xff] }
  0x63   :  { %825 = vmatpush1.bf16.msk.msra.mxu0 %vm821_vm2, %v823_v12  ;;  %829 = vmatpush1.bf16.msra.mxu1 %v828_v19  ;;  %v836_v31 = vpack.c.bf16 %v237_v30, %v235_v29  ;;  %v242_v33 = vld [vmem:[#allocation8 + $0x78] sm:$0xff]  ;;  %v239_v35 = vld [vmem:[#allocation8 + $0x60] sm:$0xff]  ;;  %v241_v36 = vld [vmem:[#allocation8 + $0x70] sm:$0xff]  ;;  %v1282_v12 = vsub.s32 0, %v1279_v11  ;;  %v1288_v14 = vsub.s32 1, %v1279_v11 }
  0x64   :  { %831 = vmatprep.subr.bf16.mxu1 %v830_v22  ;;  %v838_v34 = vpack.c.bf16 %v242_v33, %v240_v32  ;;  %v244_v37 = vld [vmem:[#allocation8 + $0x88] sm:$0xff]  ;;  %v840_v38 = vpack.c.bf16 %v241_v36, %v239_v35  ;;  %v246_v39 = vld [vmem:[#allocation8 + $0x98] sm:$0xff]  ;;  %v243_v40 = vld [vmem:[#allocation8 + $0x80] sm:$0xff] }
  0x65   :  { %v245_v41 = vld [vmem:[#allocation8 + $0x90] sm:$0xff]  ;;  %v842_v42 = vpack.c.bf16 %v246_v39, %v244_v37  ;;  %v248_v43 = vld [vmem:[#allocation8 + $0xa8] sm:$0xff]  ;;  %v250_v44 = vld [vmem:[#allocation8 + $0xb8] sm:$0xff] }
  0x66   :  { %809 = vmatmul.mubr.msk.f32.vlgmr.msra.gmra.mrb[0].mxu0 %vm115_vm3, %v94_v13  ;;  %v844_v45 = vpack.c.bf16 %v245_v41, %v243_v40  ;;  %v846_v46 = vpack.c.bf16 %v250_v44, %v248_v43  ;;  %v247_v47 = vld [vmem:[#allocation8 + $0xa0] sm:$0xff]  ;;  %v249_v48 = vld [vmem:[#allocation8 + $0xb0] sm:$0xff]  ;;  %v252_v49 = vld [vmem:[#allocation8 + $0xc8] sm:$0xff] }
  0x67   :  { %833 = vmatpush1.bf16.msra.mxu1 %v832_v25  ;;  %v254_v50 = vld [vmem:[#allocation8 + $0xd8] sm:$0xff]  ;;  %v848_v51 = vpack.c.bf16 %v249_v48, %v247_v47  ;;  %v251_v53 = vld [vmem:[#allocation8 + $0xc0] sm:$0xff]  ;;  %v253_v54 = vld [vmem:[#allocation8 + $0xd0] sm:$0xff] }
  0x68   :  { %835 = vmatprep.subr.bf16.mxu1 %v834_v28  ;;  %v850_v52 = vpack.c.bf16 %v254_v50, %v252_v49  ;;  %v256_v55 = vld [vmem:[#allocation8 + $0xe8] sm:$0xff]  ;;  %v258_v56 = vld [vmem:[#allocation8 + $0xf8] sm:$0xff]  ;;  %v852_v57 = vpack.c.bf16 %v253_v54, %v251_v53  ;;  %v255_v59 = vld [vmem:[#allocation8 + $0xe0] sm:$0xff] }
  0x69   :  { %v854_v58 = vpack.c.bf16 %v258_v56, %v256_v55  ;;  %v257_v60 = vld [vmem:[#allocation8 + $0xf0] sm:$0xff]  ;;  %v260_v61 = vld [vmem:[#allocation8 + $0x108] sm:$0xff]  ;;  %v262_v62 = vld [vmem:[#allocation8 + $0x118] sm:$0xff] }
  0x6a   :  { %v856_v63 = vpack.c.bf16 %v257_v60, %v255_v59  ;;  %v858_v0 = vpack.c.bf16 %v262_v62, %v260_v61  ;;  %v259_v1 = vld [vmem:[#allocation8 + $0x100] sm:$0xff]  ;;  %v261_v2 = vld [vmem:[#allocation8 + $0x110] sm:$0xff]  ;;  %v264_v3 = vld [vmem:[#allocation8 + $0x128] sm:$0xff] }
  0x6b   :  { %837 = vmatpush1.bf16.msra.mxu1 %v836_v31  ;;  %v266_v4 = vld [vmem:[#allocation8 + $0x138] sm:$0xff]  ;;  %v860_v5 = vpack.c.bf16 %v261_v2, %v259_v1  ;;  %v263_v7 = vld [vmem:[#allocation8 + $0x120] sm:$0xff]  ;;  %v265_v8 = vld [vmem:[#allocation8 + $0x130] sm:$0xff] }
  0x6c   :  { %839 = vmatprep.subr.bf16.mxu1 %v838_v34  ;;  %v862_v6 = vpack.c.bf16 %v266_v4, %v264_v3  ;;  %v864_v9 = vpack.c.bf16 %v265_v8, %v263_v7  ;;  %v103_v13 = vld [vmem:[%s1340_s3] sm:$0x3]  ;;  %v386_v49 = vld [vmem:[#allocation8 + $0x148] sm:$0xff]  ;;  %v388_v50 = vld [vmem:[#allocation8 + $0x158] sm:$0xff] }
  0x6d   :  { %v108_v15 = vrot.slane %v103_v13, %v1282_v12  ;;  %v112_v16 = vrot.slane %v103_v13, %v1288_v14  ;;  %v387_v53 = vld [vmem:[#allocation8 + $0x150] sm:$0xff]  ;;  %v390_v55 = vld [vmem:[#allocation8 + $0x168] sm:$0xff]  ;;  %v392_v56 = vld [vmem:[#allocation8 + $0x178] sm:$0xff] }
  0x6e   :  { %v391_v59 = vld [vmem:[#allocation8 + $0x170] sm:$0xff]  ;;  %v394_v61 = vld [vmem:[#allocation8 + $0x188] sm:$0xff]  ;;  %v396_v62 = vld [vmem:[#allocation8 + $0x198] sm:$0xff] }
  0x6f   :  { %841 = vmatpush1.bf16.msra.mxu1 %v840_v38  ;;  %v395_v1 = vld [vmem:[#allocation8 + $0x190] sm:$0xff]  ;;  %v398_v3 = vld [vmem:[#allocation8 + $0x1a8] sm:$0xff]  ;;  %v400_v4 = vld [vmem:[#allocation8 + $0x1b8] sm:$0xff] }
  0x70   :  { %843 = vmatprep.subr.bf16.mxu1 %v842_v42  ;;  %v399_v7 = vld [vmem:[#allocation8 + $0x1b0] sm:$0xff]  ;;  %v404_v10 = vld [vmem:[#allocation8 + $0x1d8] sm:$0xff] }
  0x73   :  { %845 = vmatpush1.bf16.msra.mxu1 %v844_v45 }
  0x74   :  { %847 = vmatprep.subr.bf16.mxu1 %v846_v46 }
  0x77   :  { %849 = vmatpush1.bf16.msra.mxu1 %v848_v51  ;;  %v866_v51 = vpack.c.bf16 %v388_v50, %v386_v49 }
  0x78   :  { %851 = vmatprep.subr.bf16.mxu1 %v850_v52  ;;  %v385_v52 = vld [vmem:[#allocation8 + $0x140] sm:$0xff] }
  0x79   :  { %v868_v54 = vpack.c.bf16 %v387_v53, %v385_v52  ;;  %867 = vmatprep.subr.bf16.mxu0 %v866_v51 }
  0x7b   :  { %853 = vmatpush1.bf16.msra.mxu1 %v852_v57  ;;  %869 = vmatpush1.bf16.msra.mxu0 %v868_v54  ;;  %v870_v57 = vpack.c.bf16 %v392_v56, %v390_v55 }
  0x7c   :  { %855 = vmatprep.subr.bf16.mxu1 %v854_v58  ;;  %v389_v58 = vld [vmem:[#allocation8 + $0x160] sm:$0xff] }
  0x7d   :  { %v872_v60 = vpack.c.bf16 %v391_v59, %v389_v58  ;;  %871 = vmatprep.subr.bf16.mxu0 %v870_v57 }
  0x7f   :  { %857 = vmatpush1.bf16.msra.mxu1 %v856_v63  ;;  %873 = vmatpush1.bf16.msra.mxu0 %v872_v60  ;;  %v874_v63 = vpack.c.bf16 %v396_v62, %v394_v61 }
  0x80   :  { %859 = vmatprep.subr.bf16.mxu1 %v858_v0  ;;  %v393_v0 = vld [vmem:[#allocation8 + $0x180] sm:$0xff] }
  0x81   :  { %v876_v2 = vpack.c.bf16 %v395_v1, %v393_v0  ;;  %875 = vmatprep.subr.bf16.mxu0 %v874_v63 }
  0x83   :  { %861 = vmatpush1.bf16.msra.mxu1 %v860_v5  ;;  %877 = vmatpush1.bf16.msra.mxu0 %v876_v2  ;;  %v878_v5 = vpack.c.bf16 %v400_v4, %v398_v3 }
  0x84   :  { %863 = vmatprep.subr.bf16.mxu1 %v862_v6  ;;  %v397_v6 = vld [vmem:[#allocation8 + $0x1a0] sm:$0xff] }
  0x85   :  { %v880_v8 = vpack.c.bf16 %v399_v7, %v397_v6  ;;  %879 = vmatprep.subr.bf16.mxu0 %v878_v5 }
  0x87   :  { %865 = vmatpush1.bf16.msra.mxu1 %v864_v9  ;;  %881 = vmatpush1.bf16.msra.mxu0 %v880_v8  ;;  %v402_v9 = vld [vmem:[#allocation8 + $0x1c8] sm:$0xff] }
  0x88   :  { %v882_v13 = vpack.c.bf16 %v404_v10, %v402_v9 }
  0x8a   :  { %883 = vmatprep.subr.bf16.mxu0 %v882_v13 }
 0x139   :  { %v192_v17 = vpop.f32.mrb[0].mxu0 }
 0x13a   :  { %v193_v18 = vadd.f32 %v192_v17, %v108_v15  ;;  %v194_v19 = vpop.f32.mrb[1].mxu0  ;;  %v401_v15 = vld [vmem:[#allocation8 + $0x1c0] sm:$0xff] }
 0x13b   :  { %v195_v20 = vadd.f32 %v194_v19, %v112_v16  ;;  %v403_v16 = vld [vmem:[#allocation8 + $0x1d0] sm:$0xff]  ;;  %v408_v19 = vld [vmem:[#allocation8 + $0x1f8] sm:$0xff] }
 0x13c   :  { %v199_v21 = vand.u32 2147483647, %v193_v18  ;;  %v197_v45 = vmax.f32 %v193_v18, 0.0  ;;  %v884_v17 = vpack.c.bf16 %v403_v16, %v401_v15  ;;  %v406_v18 = vld [vmem:[#allocation8 + $0x1e8] sm:$0xff] }
 0x13d   :  { %v200_v22 = vand.u32 2147483647, %v195_v20  ;;  %v198_v43 = vmax.f32 %v195_v20, 0.0  ;;  %v886_v20 = vpack.c.bf16 %v408_v19, %v406_v18 }
 0x13e   :  { %v201_v23 = vsub.f32 0.0, %v199_v21  ;;  %885 = vmatpush1.bf16.msra.mxu0 %v884_v17  ;;  %v405_v21 = vld [vmem:[#allocation8 + $0x1e0] sm:$0xff] }
 0x13f   :  { %v202_v24 = vsub.f32 0.0, %v200_v22  ;;  %v407_v22 = vld [vmem:[#allocation8 + $0x1f0] sm:$0xff]  ;;  %887 = vmatprep.subr.bf16.mxu0 %v886_v20 }
 0x140   :  { %v203_v25 = vmul.f32 1.442695, %v201_v23  ;;  %v888_v23 = vpack.c.bf16 %v407_v22, %v405_v21  ;;  %v543_v22 = vld [vmem:[#allocation10 + $0x8] sm:$0xff] }
 0x141   :  { %v205_v26 = vmul.f32 1.442695, %v202_v24  ;;  %v410_v24 = vld [vmem:[#allocation8 + $0x208] sm:$0xff] }
 0x142   :  { %990 = vpow2.f32 %v203_v25  ;;  %889 = vmatpush1.bf16.msra.mxu0 %v888_v23  ;;  %v412_v25 = vld [vmem:[#allocation8 + $0x218] sm:$0xff]  ;;  %v546_v23 = vld [vmem:[#allocation10 + $0x20] sm:$0xff] }
 0x143   :  { %992 = vpow2.f32 %v205_v26  ;;  %v890_v26 = vpack.c.bf16 %v412_v25, %v410_v24  ;;  %v906_v24 = vpack.c.bf16 %v546_v23, %v543_v22  ;;  %v542_v25 = vld [vmem:[#allocation10] sm:$0xff]  ;;  %v583_v23 = vld [vmem:[#allocation10 + $0x148] sm:$0xff] }
 0x145   :  { %891 = vmatprep.subr.bf16.mxu0 %v890_v26  ;;  %v545_v26 = vld [vmem:[#allocation10 + $0x18] sm:$0xff]  ;;  %907 = vmatprep.subr.bf16.mxu1 %v906_v24 }
 0x14c   :  { %v991_v27 = vpop.eup %990 }
 0x14d   :  { %v993_v28 = vpop.eup %992  ;;  %v207_v29 = vadd.f32 1.0, %v991_v27  ;;  %v210_v31 = vmul.f32 -0.5, %v991_v27  ;;  %v213_v35 = vand.u32 2147483647, %v991_v27 }
 0x14e   :  { %v216_v30 = vadd.f32 1.0, %v993_v28  ;;  %v219_v32 = vmul.f32 -0.5, %v993_v28  ;;  %v222_v36 = vand.u32 2147483647, %v993_v28 }
 0x14f   :  { %994 = vlog2.f32 %v207_v29  ;;  %v211_v33 = vadd.f32 1.0, %v210_v31  ;;  %vm214_vm4 = vcmp.lt.f32.partialorder %v213_v35, 0.0004427343  ;;  %v416_v31 = vld [vmem:[#allocation8 + $0x238] sm:$0xff] }
 0x150   :  { %996 = vlog2.f32 %v216_v30  ;;  %v220_v34 = vadd.f32 1.0, %v219_v32  ;;  %vm223_vm5 = vcmp.lt.f32.partialorder %v222_v36, 0.0004427343  ;;  %v414_v30 = vld [vmem:[#allocation8 + $0x228] sm:$0xff] }
 0x151   :  { %v212_v40 = vmul.f32 %v991_v27, %v211_v33  ;;  %v409_v27 = vld [vmem:[#allocation8 + $0x200] sm:$0xff]  ;;  %v894_v32 = vpack.c.bf16 %v416_v31, %v414_v30  ;;  %v418_v36 = vld [vmem:[#allocation8 + $0x248] sm:$0xff]  ;;  %v1165_v30 = vmov 0.0|0.0  }
 0x152   :  { %v221_v42 = vmul.f32 %v993_v28, %v220_v34  ;;  %v411_v28 = vld [vmem:[#allocation8 + $0x210] sm:$0xff]  ;;  %v413_v33 = vld [vmem:[#allocation8 + $0x220] sm:$0xff] }
 0x153   :  { %v892_v29 = vpack.c.bf16 %v411_v28, %v409_v27  ;;  %v415_v34 = vld [vmem:[#allocation8 + $0x230] sm:$0xff]  ;;  %v908_v28 = vpack.c.bf16 %v545_v26, %v542_v25  ;;  %v585_v25 = vld [vmem:[#allocation10 + $0x158] sm:$0xff] }
 0x154   :  { %v896_v35 = vpack.c.bf16 %v415_v34, %v413_v33  ;;  %v544_v27 = vld [vmem:[#allocation10 + $0x10] sm:$0xff] }
 0x155   :  { %893 = vmatpush1.bf16.msra.mxu0 %v892_v29  ;;  %v547_v29 = vld [vmem:[#allocation10 + $0x28] sm:$0xff]  ;;  %v552_v33 = vld [vmem:[#allocation10 + $0x50] sm:$0xff] }
 0x156   :  { %895 = vmatprep.subr.bf16.mxu0 %v894_v32  ;;  %v947_v31 = vpack.c.bf16 %v547_v29, %v544_v27  ;;  %v549_v32 = vld [vmem:[#allocation10 + $0x38] sm:$0xff]  ;;  %v588_v26 = vld [vmem:[#allocation10 + $0x170] sm:$0xff]  ;;  %v587_v29 = vld [vmem:[#allocation10 + $0x168] sm:$0xff] }
 0x157   :  { %v910_v34 = vpack.c.bf16 %v552_v33, %v549_v32  ;;  %v934_v27 = vpack.c.bf16 %v588_v26, %v585_v25  ;;  %v589_v33 = vld [vmem:[#allocation10 + $0x178] sm:$0xff] }
 0x158   :  { %v815_v26 = vld [vmem:[#allocation5] ss:$0 sm:$0xff] }
 0x159   :  { %v995_v37 = vpop.eup %994  ;;  %897 = vmatpush1.bf16.msra.mxu0 %v896_v35  ;;  %v548_v35 = vld [vmem:[#allocation10 + $0x30] sm:$0xff]  ;;  %771 = vst.msk [vmem:[#allocation11] sm:$0xff] %vm770_vm11, %v815_v26 }
 0x15a   :  { %v997_v38 = vpop.eup %996  ;;  %v209_v39 = vmul.f32 0.6931472, %v995_v37  ;;  %v420_v37 = vld [vmem:[#allocation8 + $0x258] sm:$0xff] }
 0x15b   :  { %v218_v41 = vmul.f32 0.6931472, %v997_v38  ;;  %v898_v38 = vpack.c.bf16 %v420_v37, %v418_v36  ;;  %v551_v36 = vld [vmem:[#allocation10 + $0x48] sm:$0xff]  ;;  %v550_v37 = vld [vmem:[#allocation10 + $0x40] sm:$0xff] }
 0x15c   :  { %v215_v44 = vsel %vm214_vm4, %v212_v40, %v209_v39  ;;  %v417_v39 = vld [vmem:[#allocation8 + $0x240] sm:$0xff]  ;;  %v419_v40 = vld [vmem:[#allocation8 + $0x250] sm:$0xff] }
 0x15d   :  { %v224_v46 = vsel %vm223_vm5, %v221_v42, %v218_v41  ;;  %v225_v48 = vadd.f32 %v215_v44, %v197_v45  ;;  %v900_v41 = vpack.c.bf16 %v419_v40, %v417_v39  ;;  %899 = vmatprep.subr.bf16.mxu0 %v898_v38  ;;  %v422_v42 = vld [vmem:[#allocation8 + $0x268] sm:$0xff]  ;;  %v421_v45 = vld [vmem:[#allocation8 + $0x260] sm:$0xff]  ;;  %v912_v38 = vpack.c.bf16 %v551_v36, %v548_v35  ;;  %v553_v39 = vld [vmem:[#allocation10 + $0x58] sm:$0xff] }
 0x15e   :  { %v226_v47 = vadd.f32 %v224_v46, %v198_v43  ;;  %v424_v43 = vld [vmem:[#allocation8 + $0x278] sm:$0xff]  ;;  %v423_v46 = vld [vmem:[#allocation8 + $0x270] sm:$0xff]  ;;  %v950_v40 = vpack.c.bf16 %v553_v39, %v550_v37  ;;  %v591_v35 = vld [vmem:[#allocation10 + $0x188] sm:$0xff] }
 0x15f   :  { %901 = vmatpush1.bf16.msra.mxu0 %v900_v41  ;;  %v902_v44 = vpack.c.bf16 %v424_v43, %v422_v42  ;;  %v555_v41 = vld [vmem:[#allocation10 + $0x68] sm:$0xff]  ;;  %v558_v42 = vld [vmem:[#allocation10 + $0x80] sm:$0xff]  ;;  %v593_v39 = vld [vmem:[#allocation10 + $0x198] sm:$0xff] }
 0x160   :  { %810 = vmatprep.mubr.msk.f32.mxu1 %vm279_vm6, %v226_v47  ;;  %v904_v47 = vpack.c.bf16 %v423_v46, %v421_v45  ;;  %v914_v43 = vpack.c.bf16 %v558_v42, %v555_v41  ;;  %v557_v45 = vld [vmem:[#allocation10 + $0x78] sm:$0xff]  ;;  %v556_v46 = vld [vmem:[#allocation10 + $0x70] sm:$0xff]  ;;  %v594_v36 = vld [vmem:[#allocation10 + $0x1a0] sm:$0xff] }
 0x161   :  { %348 = vmatmul.mubr.f32.vlgmr.msra.gmra.mrb[0].mxu1 %v225_v48  ;;  %903 = vmatprep.subr.bf16.mxu0 %v902_v44  ;;  %v267_v48 = vld [vmem:[%s1342_s5] sm:$0x3]  ;;  %v554_v44 = vld [vmem:[#allocation10 + $0x60] sm:$0xff]  ;;  %v938_v37 = vpack.c.bf16 %v594_v36, %v591_v35  ;;  %v595_v42 = vld [vmem:[#allocation10 + $0x1a8] sm:$0xff] }
 0x162   :  { %v272_v49 = vrot.slane %v267_v48, %v1282_v12  ;;  %v276_v50 = vrot.slane %v267_v48, %v1288_v14  ;;  %909 = vmatpush1.bf16.msra.mxu1 %v908_v28  ;;  %v559_v48 = vld [vmem:[#allocation10 + $0x88] sm:$0xff]  ;;  %v584_v28 = vld [vmem:[#allocation10 + $0x150] sm:$0xff] }
 0x163   :  { %905 = vmatpush1.bf16.msra.mxu0 %v904_v47  ;;  %911 = vmatprep.subr.bf16.mxu1 %v910_v34  ;;  %v916_v47 = vpack.c.bf16 %v557_v45, %v554_v44  ;;  %v936_v32 = vpack.c.bf16 %v587_v29, %v584_v28  ;;  %v597_v44 = vld [vmem:[#allocation10 + $0x1b8] sm:$0xff]  ;;  %v600_v45 = vld [vmem:[#allocation10 + $0x1d0] sm:$0xff] }
 0x164   :  { %946 = vmatprep.subr.bf16.mxu0 %v1165_v30  ;;  %v602_v28 = vld [vmem:[%s1344_s7] sm:$0x7]  ;;  %s1167_s7 = smov [#allocation11]  }
 0x165   :  { %v607_v29 = vrot.slane %v602_v28, %v1282_v12  ;;  %v611_v36 = vrot.slane %v602_v28, %v1288_v14  ;;  %s796_s27 = sshll.u32 %s1167_s7, 4  ;;  %s797_s27 = int_to_ptr.vmem [resolvable:$true] %s796_s27 }
 0x166   :  { %913 = vmatpush1.bf16.msra.mxu1 %v912_v38  ;;  %v590_v38 = vld [vmem:[#allocation10 + $0x180] sm:$0xff]  ;;  %s1124_s29 = scalar_lea.vmem %s797_s27, 384  ;;  %p1129_p13 = scmp.lt.s32.totalorder %s797_s27, %s797_s27 }
 0x167   :  { %915 = vmatprep.subr.bf16.mxu1 %v914_v43  ;;  %v940_v41 = vpack.c.bf16 %v593_v39, %v590_v38  ;;  %p1125_p12 = scmp.ne.s32.totalorder %s797_s27, %s1124_s29  ;;  %p1130_p0 = scmp.lt.s32.totalorder %s1124_s29, %s1124_s29 }
 0x169   :  { %p1131_p1 = por %p1130_p0, %p1129_p13 }
 0x16a   :  { %917 = vmatpush1.bf16.msra.mxu1 %v916_v47  ;;  %v596_v47 = vld [vmem:[#allocation10 + $0x1b0] sm:$0xff] }
 0x16b   :  { %p1132_p2 = pnand %p1131_p1, %p1125_p12 }
 0x234   :  { %v349_v51 = vpop.f32.mrb[0].mxu1 }
 0x235   :  { %v350_v52 = vadd.f32 %v349_v51, %v272_v49  ;;  %v351_v53 = vpop.f32.mrb[1].mxu1  ;;  %v953_v49 = vpack.c.bf16 %v559_v48, %v556_v46  ;;  %v564_v51 = vld [vmem:[#allocation10 + $0xb0] sm:$0xff]  ;;  %v942_v46 = vpack.c.bf16 %v600_v45, %v597_v44  ;;  %v599_v48 = vld [vmem:[#allocation10 + $0x1c8] sm:$0xff] }
 0x236   :  { %v352_v54 = vadd.f32 %v351_v53, %v276_v50  ;;  %v561_v50 = vld [vmem:[#allocation10 + $0x98] sm:$0xff]  ;;  %v560_v53 = vld [vmem:[#allocation10 + $0x90] sm:$0xff] }
 0x237   :  { %v356_v55 = vand.u32 2147483647, %v350_v52  ;;  %v354_v18 = vmax.f32 %v350_v52, 0.0  ;;  %v918_v52 = vpack.c.bf16 %v564_v51, %v561_v50  ;;  %v944_v50 = vpack.c.bf16 %v599_v48, %v596_v47  ;;  %v601_v51 = vld [vmem:[#allocation10 + $0x1d8] sm:$0xff] }
 0x238   :  { %v357_v56 = vand.u32 2147483647, %v352_v54  ;;  %v355_v17 = vmax.f32 %v352_v54, 0.0  ;;  %v563_v54 = vld [vmem:[#allocation10 + $0xa8] sm:$0xff] }
 0x239   :  { %v358_v57 = vsub.f32 0.0, %v356_v55  ;;  %v562_v55 = vld [vmem:[#allocation10 + $0xa0] sm:$0xff]  ;;  %919 = vmatprep.subr.bf16.mxu1 %v918_v52 }
 0x23a   :  { %v359_v58 = vsub.f32 0.0, %v357_v56  ;;  %v920_v56 = vpack.c.bf16 %v563_v54, %v560_v53  ;;  %v811_v53 = vld [vmem:[%s1342_s5 + $0x2] sm:$0x3] }
 0x23b   :  { %v360_v59 = vmul.f32 1.442695, %v358_v57  ;;  %v565_v57 = vld [vmem:[#allocation10 + $0xb8] sm:$0xff]  ;;  %v431_v54 = vrot.slane %v811_v53, %v1282_v12 }
 0x23c   :  { %v362_v60 = vmul.f32 1.442695, %v359_v58  ;;  %v956_v58 = vpack.c.bf16 %v565_v57, %v562_v55  ;;  %921 = vmatpush1.bf16.msra.mxu1 %v920_v56  ;;  %v435_v55 = vrot.slane %v811_v53, %v1288_v14 }
 0x23d   :  { %998 = vpow2.f32 %v360_v59  ;;  %v567_v59 = vld [vmem:[#allocation10 + $0xc8] sm:$0xff] }
 0x23e   :  { %1000 = vpow2.f32 %v362_v60  ;;  %v570_v60 = vld [vmem:[#allocation10 + $0xe0] sm:$0xff] }
 0x247   :  { %v999_v61 = vpop.eup %998 }
 0x248   :  { %v1001_v62 = vpop.eup %1000  ;;  %v364_v63 = vadd.f32 1.0, %v999_v61  ;;  %v367_v1 = vmul.f32 -0.5, %v999_v61  ;;  %v370_v4 = vand.u32 2147483647, %v999_v61 }
 0x249   :  { %v373_v0 = vadd.f32 1.0, %v1001_v62  ;;  %v376_v2 = vmul.f32 -0.5, %v1001_v62  ;;  %v379_v6 = vand.u32 2147483647, %v1001_v62 }
 0x24a   :  { %1002 = vlog2.f32 %v364_v63  ;;  %v368_v3 = vadd.f32 1.0, %v367_v1  ;;  %vm371_vm7 = vcmp.lt.f32.partialorder %v370_v4, 0.0004427343  ;;  %v569_v63 = vld [vmem:[#allocation10 + $0xd8] sm:$0xff] }
 0x24b   :  { %1004 = vlog2.f32 %v373_v0  ;;  %v377_v5 = vadd.f32 1.0, %v376_v2  ;;  %vm380_vm8 = vcmp.lt.f32.partialorder %v379_v6, 0.0004427343  ;;  %v568_v0 = vld [vmem:[#allocation10 + $0xd0] sm:$0xff]  ;;  %v571_v2 = vld [vmem:[#allocation10 + $0xe8] sm:$0xff]  ;;  %v573_v4 = vld [vmem:[#allocation10 + $0xf8] sm:$0xff] }
 0x24c   :  { %v369_v10 = vmul.f32 %v999_v61, %v368_v3  ;;  %v922_v61 = vpack.c.bf16 %v570_v60, %v567_v59  ;;  %v959_v3 = vpack.c.bf16 %v571_v2, %v568_v0 }
 0x24d   :  { %v378_v15 = vmul.f32 %v1001_v62, %v377_v5  ;;  %v566_v62 = vld [vmem:[#allocation10 + $0xc0] sm:$0xff]  ;;  %v576_v5 = vld [vmem:[#allocation10 + $0x110] sm:$0xff] }
 0x24e   :  { %v924_v1 = vpack.c.bf16 %v569_v63, %v566_v62  ;;  %923 = vmatprep.subr.bf16.mxu1 %v922_v61  ;;  %v926_v6 = vpack.c.bf16 %v576_v5, %v573_v4 }
 0x250   :  { %925 = vmatpush1.bf16.msra.mxu1 %v924_v1 }
 0x251   :  { %927 = vmatprep.subr.bf16.mxu1 %v926_v6 }
 0x254   :  { %v1003_v7 = vpop.eup %1002 }
 0x255   :  { %v1005_v8 = vpop.eup %1004  ;;  %v366_v9 = vmul.f32 0.6931472, %v1003_v7  ;;  %v572_v7 = vld [vmem:[#allocation10 + $0xf0] sm:$0xff] }
 0x256   :  { %v375_v13 = vmul.f32 0.6931472, %v1005_v8  ;;  %v575_v8 = vld [vmem:[#allocation10 + $0x108] sm:$0xff] }
 0x257   :  { %v372_v16 = vsel %vm371_vm7, %v369_v10, %v366_v9  ;;  %v574_v9 = vld [vmem:[#allocation10 + $0x100] sm:$0xff]  ;;  %v928_v10 = vpack.c.bf16 %v575_v8, %v572_v7 }
 0x258   :  { %v381_v19 = vsel %vm380_vm8, %v378_v15, %v375_v13  ;;  %v382_v21 = vadd.f32 %v372_v16, %v354_v18  ;;  %v577_v13 = vld [vmem:[#allocation10 + $0x118] sm:$0xff]  ;;  %v579_v16 = vld [vmem:[#allocation10 + $0x128] sm:$0xff] }
 0x259   :  { %v383_v20 = vadd.f32 %v381_v19, %v355_v17  ;;  %v962_v15 = vpack.c.bf16 %v577_v13, %v574_v9  ;;  %929 = vmatpush1.bf16.msra.mxu1 %v928_v10  ;;  %v582_v17 = vld [vmem:[#allocation10 + $0x140] sm:$0xff] }
 0x25a   :  { %v930_v18 = vpack.c.bf16 %v582_v17, %v579_v16  ;;  %v578_v19 = vld [vmem:[#allocation10 + $0x120] sm:$0xff] }
 0x25b   :  { %812 = vmatprep.mubr.msk.f32.mxu0 %vm279_vm6, %v383_v20  ;;  %v581_v20 = vld [vmem:[#allocation10 + $0x138] sm:$0xff] }
 0x25c   :  { %506 = vmatmul.mubr.f32.vlgmr.msra.gmra.mrb[2].mxu0 %v382_v21  ;;  %v580_v21 = vld [vmem:[#allocation10 + $0x130] sm:$0xff]  ;;  %v932_v22 = vpack.c.bf16 %v581_v20, %v578_v19  ;;  %931 = vmatprep.subr.bf16.mxu1 %v930_v18 }
 0x25d   :  { %948 = vmatpush1.bf16.msra.mxu0 %v947_v31  ;;  %v965_v24 = vpack.c.bf16 %v583_v23, %v580_v21  ;;  %v586_v31 = vld [vmem:[#allocation10 + $0x160] sm:$0xff] }
 0x25e   :  { %949 = vmatprep.subr.bf16.mxu0 %v1165_v30  ;;  %933 = vmatpush1.bf16.msra.mxu1 %v932_v22  ;;  %v968_v34 = vpack.c.bf16 %v589_v33, %v586_v31 }
 0x25f   :  { %935 = vmatprep.subr.bf16.mxu1 %v934_v27  ;;  %v614_v27 = vsub.s32 2, %v1279_v11 }
 0x261   :  { %951 = vmatpush1.bf16.msra.mxu0 %v950_v40  ;;  %v592_v40 = vld [vmem:[#allocation10 + $0x190] sm:$0xff]  ;;  %v615_v31 = vrot.slane %v602_v28, %v614_v27 }
 0x262   :  { %952 = vmatprep.subr.bf16.mxu0 %v1165_v30  ;;  %937 = vmatpush1.bf16.msra.mxu1 %v936_v32  ;;  %v971_v43 = vpack.c.bf16 %v595_v42, %v592_v40 }
 0x263   :  { %939 = vmatprep.subr.bf16.mxu1 %v938_v37 }
 0x265   :  { %954 = vmatpush1.bf16.msra.mxu0 %v953_v49  ;;  %v598_v49 = vld [vmem:[#allocation10 + $0x1c0] sm:$0xff] }
 0x266   :  { %955 = vmatprep.subr.bf16.mxu0 %v1165_v30  ;;  %941 = vmatpush1.bf16.msra.mxu1 %v940_v41  ;;  %v974_v52 = vpack.c.bf16 %v601_v51, %v598_v49 }
 0x267   :  { %943 = vmatprep.subr.bf16.mxu1 %v942_v46 }
 0x269   :  { %957 = vmatpush1.bf16.msra.mxu0 %v956_v58 }
 0x26a   :  { %958 = vmatprep.subr.bf16.mxu0 %v1165_v30  ;;  %945 = vmatpush1.bf16.msra.mxu1 %v944_v50 }
 0x26d   :  { %960 = vmatpush1.bf16.msra.mxu0 %v959_v3 }
 0x26e   :  { %961 = vmatprep.subr.bf16.mxu0 %v1165_v30 }
 0x271   :  { %963 = vmatpush1.bf16.msra.mxu0 %v962_v15 }
 0x272   :  { %964 = vmatprep.subr.bf16.mxu0 %v1165_v30 }
 0x275   :  { %966 = vmatpush1.bf16.msra.mxu0 %v965_v24 }
 0x276   :  { %967 = vmatprep.subr.bf16.mxu0 %v1165_v30 }
 0x279   :  { %969 = vmatpush1.bf16.msra.mxu0 %v968_v34 }
 0x27a   :  { %970 = vmatprep.subr.bf16.mxu0 %v1165_v30 }
 0x27d   :  { %972 = vmatpush1.bf16.msra.mxu0 %v971_v43 }
 0x27e   :  { %973 = vmatprep.subr.bf16.mxu0 %v1165_v30 }
 0x281   :  { %975 = vmatpush1.bf16.msra.mxu0 %v974_v52 }
 0x32f   :  { %v507_v56 = vpop.f32.mrb[2].mxu0 }
 0x330   :  { %v508_v57 = vadd.f32 %v507_v56, %v431_v54  ;;  %v509_v58 = vpop.f32.mrb[3].mxu0 }
 0x331   :  { %v510_v59 = vadd.f32 %v509_v58, %v435_v55 }
 0x332   :  { %v514_v60 = vand.u32 2147483647, %v508_v57  ;;  %v512_v22 = vmax.f32 %v508_v57, 0.0 }
 0x333   :  { %v515_v30 = vand.u32 2147483647, %v510_v59  ;;  %v513_v21 = vmax.f32 %v510_v59, 0.0 }
 0x334   :  { %v516_v61 = vsub.f32 0.0, %v514_v60 }
 0x335   :  { %v517_v62 = vsub.f32 0.0, %v515_v30 }
 0x336   :  { %v518_v63 = vmul.f32 1.442695, %v516_v61 }
 0x337   :  { %v520_v0 = vmul.f32 1.442695, %v517_v62 }
 0x338   :  { %1006 = vpow2.f32 %v518_v63 }
 0x339   :  { %1008 = vpow2.f32 %v520_v0 }
 0x342   :  { %v1007_v1 = vpop.eup %1006 }
 0x343   :  { %v1009_v2 = vpop.eup %1008  ;;  %v522_v3 = vadd.f32 1.0, %v1007_v1  ;;  %v525_v5 = vmul.f32 -0.5, %v1007_v1  ;;  %v528_v8 = vand.u32 2147483647, %v1007_v1 }
 0x344   :  { %v531_v4 = vadd.f32 1.0, %v1009_v2  ;;  %v534_v6 = vmul.f32 -0.5, %v1009_v2  ;;  %v537_v10 = vand.u32 2147483647, %v1009_v2 }
 0x345   :  { %1010 = vlog2.f32 %v522_v3  ;;  %v526_v7 = vadd.f32 1.0, %v525_v5  ;;  %vm529_vm9 = vcmp.lt.f32.partialorder %v528_v8, 0.0004427343 }
 0x346   :  { %1012 = vlog2.f32 %v531_v4  ;;  %v535_v9 = vadd.f32 1.0, %v534_v6  ;;  %vm538_vm10 = vcmp.lt.f32.partialorder %v537_v10, 0.0004427343 }
 0x347   :  { %v527_v17 = vmul.f32 %v1007_v1, %v526_v7 }
 0x348   :  { %v536_v19 = vmul.f32 %v1009_v2, %v535_v9 }
 0x34f   :  { %v1011_v13 = vpop.eup %1010 }
 0x350   :  { %v1013_v15 = vpop.eup %1012  ;;  %v524_v16 = vmul.f32 0.6931472, %v1011_v13 }
 0x351   :  { %v533_v18 = vmul.f32 0.6931472, %v1013_v15 }
 0x352   :  { %v530_v20 = vsel %vm529_vm9, %v527_v17, %v524_v16 }
 0x353   :  { %v539_v23 = vsel %vm538_vm10, %v536_v19, %v533_v18  ;;  %v540_v25 = vadd.f32 %v530_v20, %v512_v22 }
 0x354   :  { %v541_v24 = vadd.f32 %v539_v23, %v513_v21 }
 0x356   :  { %813 = vmatprep.mubr.msk.f32.mxu1 %vm279_vm6, %v541_v24  ;;  %814 = vmatprep.mubr.msk.f32.mxu0 %vm279_vm6, %v541_v24 }
 0x357   :  { %687 = vmatmul.mubr.f32.vlgmr.msra.gmra.mrb[2].mxu1 %v540_v25  ;;  %758 = vmatmul.mubr.f32.vlgmr.msra.gmra.mrb[4].mxu0 %v540_v25 }
 0x42a   :  { %v688_v32 = vpop.f32.mrb[2].mxu1  ;;  %v759_v33 = vpop.f32.mrb[4].mxu0 }
 0x42b   :  { %v689_v34 = vadd.f32 %v688_v32, %v607_v29  ;;  %v760_v35 = vadd.f32 %v759_v33, %v615_v31  ;;  %v690_v37 = vpop.f32.mrb[3].mxu1  ;;  %v761_v38 = vpop.f32.mrb[5].mxu0 }
 0x42c   :  { %v691_v39 = vadd.f32 %v690_v37, %v611_v36 }
 0x42d   :  { %779 = vrot.lane.b32.xlu1 %v760_v35, %s1166_s26  ;;  %775 = vrot.lane.b32.xlu0 %v689_v34, %s1166_s26 }
 0x431   :  { %777 = vrot.lane.b32.xlu0 %v691_v39, %s1166_s26 }
 0x49f   :  { %v776_v11 = vpop.permute.xlu0 %775  ;;  %v780_v12 = vpop.permute.xlu1 %779 }
 0x4a0   :  { %787 = vst.msk [vmem:[#allocation11] sm:$0xff] %vm786_vm12, %v776_v11 }
 0x4a3   :  { %v778_v40 = vpop.permute.xlu0 %777 }
 0x4a4   :  { %v781_v41 = vsel %vm770_vm11, %v776_v11, %v778_v40  ;;  %v782_v42 = vsel %vm770_vm11, %v778_v40, %v780_v12 }
 0x4a5   :  { %788 = vst [vmem:[#allocation11 + $0x8] sm:$0xff] %v781_v41  ;;  %789 = vst [vmem:[#allocation11 + $0x10] sm:$0xff] %v782_v42 }
 0x4a6   :  { %1135 = shalt.err (!%p1132_p2)
}
 0x4a7   :  { %s1136_s10 = scalar_lea.hbm %s1345_s8, 384 }
 0x4a8   :  { %p1137_p3 = scmp.ne.s32.totalorder %s1345_s8, %s1136_s10  ;;  %p1140_p4 = scmp.lt.u32.totalorder %s1136_s10, %s1345_s8 }
 0x4aa   :  { %p1142_p5 = pnand %p1140_p4, %p1137_p3 }
 0x4ac   :  { %1145 = shalt.err (!%p1142_p5)
}
 0x4ad   :  { %799 = dma.vmem_to_hbm [thread:$0]  %s797_s27, 384, %s1345_s8, [#allocation4]  }
 0x4ae   :  { %1152 = dma.done.wait [#allocation4], 384  }
 0x4af   :  { %1153 = vsyncadd [#allocation4], 4294966912 }
 0x4b0   :  { %803 = vsyncpa [#allocation3], 1 }
 0x4b1   :  { %804 = vsyncpa [#allocation6], 1 }
 0x4b2   :  { %805 = vsyncpa [#allocation9], 1 }
 0x4b3   :  { %806 = vsyncpa [#allocation4], 1 }

</bundles_post_ra>
